<compile_context>
chip_gen: v7x
topology: tpu7x:2x2x1
jax: 0.10.0
libtpu: 0.0.40
codegen_flags: <defaults>
</compile_context>

<pallas_src>
import jax
import jax.numpy as jnp
from jax.experimental import pallas as pl
from jax.experimental.pallas import tpu as pltpu

EPS = 1e-7       # module eps=1e-07
LANE = 128       # lane-pad filters / classes to a dense vreg width


def degram_kernel(x_ref, fb_ref, w1_ref, w2_ref, rowc_ref, bs_ref, wh_ref,
                  out_ref):
    bt, t, nbins = x_ref.shape            # (BT, T, F_bins) -- channel squeezed
    fp = fb_ref.shape[1]                  # padded filter count (128)

    # ---- SincGram: batched filterbank projection (f32 MXU) + log -----------
    # T % 8 == 0 and F_bins % 128 == 0 are asserted in the wrapper so both
    # reshapes below are free views (no VMEM copy).
    x2 = x_ref[...].reshape(bt * t, nbins)
    s = jnp.dot(x2, fb_ref[...], preferred_element_type=jnp.float32)
    s3 = jnp.log(s + EPS).reshape(bt, t, fp)                    # (BT, T, 128)

    rc = rowc_ref[...]                    # (4, 128): [b1 ; b2 ; ws ; bh]
    b1_row = rc[0:1, :]
    b2_row = rc[1:2, :]
    ws_row = rc[2:3, :]
    bh_row = rc[3:4, :]
    bs = bs_ref[0]                        # true scalar, lives in SMEM

    # ---- DE attention (ChannelSpatialSELayer, strategy='maxout') -----------
    # channel SE: squeeze over time, 2-layer bottleneck as two batched MXU
    # matmuls over the whole tile (W1/W2 zero-padded to 128x128).
    zb = jnp.mean(s3, axis=1)                                   # (BT, 128)
    h = jnp.maximum(
        jnp.dot(zb, w1_ref[...], preferred_element_type=jnp.float32) + b1_row,
        0.0)                                                    # (BT, 128)
    a = jax.nn.sigmoid(
        jnp.dot(h, w2_ref[...], preferred_element_type=jnp.float32) + b2_row)

    # spatial SE: per-time scalar gate -- one lane reduction over the tile
    q = jax.nn.sigmoid(
        jnp.sum(s3 * ws_row, axis=-1, keepdims=True) + bs)      # (BT, T, 1)

    rb = jnp.maximum(s3 * a[:, None, :], s3 * q)                # strategy='maxout'

    # ---- SpectrogramNormalization: fused one-pass mean / E[x^2] stats ------
    mu = jnp.mean(rb, axis=1, keepdims=True)                    # (BT, 1, 128)
    var = jnp.maximum(jnp.mean(rb * rb, axis=1, keepdims=True) - mu * mu, 0.0)
    inv = pl.reciprocal(jnp.sqrt(var) + EPS, approx=True)       # row recip, EUP
    rn = (rb - mu) * inv
    # TODO(synk): verify eps placement / biased-vs-unbiased std against the
    # reference SpectrogramNormalization (here: biased var, 1/(sqrt(var)+eps)).

    # ---- synthetic backbone: mean pool over time + linear head -------------
    pooled = jnp.mean(rn, axis=1)                               # (BT, 128)
    logits = jnp.dot(pooled, wh_ref[...],
                     preferred_element_type=jnp.float32) + bh_row
    out_ref[0] = logits                   # one lane-dense store per grid step


def _pick_batch_tile(B, T, Fb, *, target_rows=1024, vmem_budget=24 << 20):
    """Pick BT so BT*T is a large MXU M-extent while staying inside a VMEM
    budget that is safe on v7x (64 MiB physical) as well as v5e/v6e."""
    # per-row VMEM cost: double-buffered f32 input rows + ~4 f32 (.,128) slabs
    bytes_per_row = 2 * Fb * 4 + 4 * LANE * 4
    rows_cap = max(T, vmem_budget // bytes_per_row)
    bt = max(1, min(rows_cap // T, pl.cdiv(target_rows, T)))
    if B >= 2:
        bt = min(bt, pl.cdiv(B, 2))       # keep >= 2 grid steps (v7x megacore)
    return max(1, min(bt, B))


def degram_forward(x, params, *, n_classes, batch_tile=None):
    """x: (B, 1, T, F_bins) NCHW magnitude spectrogram -> (B, n_classes) logits."""
    B, C, T, Fb = x.shape
    assert C == 1, "expected singleton channel dim (NCHW spectrogram)"
    assert T % 8 == 0 and Fb % 128 == 0, \
        "T must be a multiple of 8 and F_bins a multiple of 128 (free reshapes)"
    fb_pad, w1_pad, w2_pad, rowc, bs, wh_pad = params
    ncp = wh_pad.shape[1]                 # padded class count (128)

    if batch_tile is None:
        batch_tile = _pick_batch_tile(B, T, Fb)
    nb = pl.cdiv(B, batch_tile)
    bp = nb * batch_tile
    if bp != B:
        # remainder batches are zero-padded (extra HBM copy only in this case)
        x = jnp.pad(x, ((0, bp - B), (0, 0), (0, 0), (0, 0)))

    # TODO(synk): if the spectrogram producer can emit bf16, feed bf16 here to
    # halve input HBM bytes (kernel is HBM-bound); f32 kept for reference parity.
    out = pl.pallas_call(
        degram_kernel,
        out_shape=jax.ShapeDtypeStruct((nb, batch_tile, ncp), jnp.float32),
        grid_spec=pltpu.PrefetchScalarGridSpec(
            num_scalar_prefetch=0,
            grid=(nb,),
            in_specs=[
                # NCHW input indexed directly; channel dim squeezed in-spec.
                pl.BlockSpec((batch_tile, None, T, Fb), lambda b: (b, 0, 0, 0)),
                pl.BlockSpec(fb_pad.shape, lambda b: (0, 0)),
                pl.BlockSpec(w1_pad.shape, lambda b: (0, 0)),
                pl.BlockSpec(w2_pad.shape, lambda b: (0, 0)),
                pl.BlockSpec(rowc.shape, lambda b: (0, 0)),
                pl.BlockSpec(memory_space=pltpu.MemorySpace.SMEM),   # bs scalar
                pl.BlockSpec(wh_pad.shape, lambda b: (0, 0)),
            ],
            # lane-dense (BT, 128) logits slab, one HBM writeback per step
            out_specs=pl.BlockSpec((1, batch_tile, ncp), lambda b: (b, 0, 0)),
        ),
        compiler_params=pltpu.CompilerParams(
            dimension_semantics=("parallel",),
            vmem_limit_bytes=48 << 20),
    )(x, fb_pad, w1_pad, w2_pad, rowc, bs, wh_pad)

    return out.reshape(bp, ncp)[:B, :n_classes]


# ---------------- parameter construction (plain-JAX glue, one-time) ----------
def _hz_to_mel(f):
    return 2595.0 * jnp.log10(1.0 + f / 700.0)


def _mel_to_hz(m):
    return 700.0 * (10.0 ** (m / 2595.0) - 1.0)


def _pad_lanes(a, width=LANE):
    pad = width - a.shape[-1]
    if pad <= 0:
        return a
    return jnp.pad(a, [(0, 0)] * (a.ndim - 1) + [(0, pad)])


def make_sincgram_filterbank(num_bins, filters, order, sample_rate,
                             lower_edge_hertz=0.0, upper_edge_hertz=None):
    """Mel-initialized generalized (order-2*order Butterworth-like) band-pass
    magnitude responses sampled on the spectrogram bins: (num_bins, filters)."""
    nyquist = sample_rate / 2.0
    upper = nyquist if upper_edge_hertz is None else upper_edge_hertz
    mel_pts = jnp.linspace(_hz_to_mel(jnp.float32(lower_edge_hertz)),
                           _hz_to_mel(jnp.float32(upper)), filters + 2)
    hz_pts = _mel_to_hz(mel_pts)
    f_lo, f_c, f_hi = hz_pts[:-2], hz_pts[1:-1], hz_pts[2:]
    bw = jnp.maximum(f_hi - f_lo, 1.0)
    bin_freqs = jnp.linspace(0.0, nyquist, num_bins)
    ratio = (bin_freqs[:, None] - f_c[None, :]) / (bw[None, :] / 2.0)
    fb = 1.0 / (1.0 + ratio ** (2 * order))
    fb = fb / (jnp.sum(fb, axis=0, keepdims=True) + EPS)      # area-normalize
    return fb.astype(jnp.float32)


def make_degram_params(keys, num_bins, filters, order, hidden, n_cls, sample_rate):
    kw1, kw2, kws, kwh, kb1, kb2, kbs, kbh = keys
    fb = make_sincgram_filterbank(num_bins, filters, order, sample_rate)
    fb_pad = _pad_lanes(fb)                                    # (num_bins, 128) f32

    w1 = 0.1 * jax.random.normal(kw1, (filters, hidden), jnp.float32)
    w2 = 0.1 * jax.random.normal(kw2, (hidden, filters), jnp.float32)
    ws = 0.1 * jax.random.normal(kws, (filters,), jnp.float32)
    wh = 0.1 * jax.random.normal(kwh, (filters, n_cls), jnp.float32)
    b1 = 0.05 * jax.random.normal(kb1, (1, hidden), jnp.float32)
    b2 = 0.05 * jax.random.normal(kb2, (1, filters), jnp.float32)
    bs = 0.05 * jax.random.normal(kbs, (1,), jnp.float32)
    bh = 0.05 * jax.random.normal(kbh, (1, n_cls), jnp.float32)

    # SE bottleneck weights zero-padded to (128, 128) so the squeeze-excite
    # runs as two batched MXU matmuls (padded lanes stay masked by the zeros).
    w1_pad = jnp.pad(w1, ((0, LANE - filters), (0, LANE - hidden)))
    w2_pad = jnp.pad(w2, ((0, LANE - hidden), (0, LANE - filters)))
    wh_pad = jnp.pad(wh, ((0, LANE - filters), (0, LANE - n_cls)))
    # consolidated 128-wide bias/weight rows: [b1 ; b2 ; ws ; bh]
    rowc = jnp.concatenate(
        [_pad_lanes(b1), _pad_lanes(b2), _pad_lanes(ws[None, :]), _pad_lanes(bh)],
        axis=0)                                                # (4, 128)
    return fb_pad, w1_pad, w2_pad, rowc, bs, wh_pad


if __name__ == "__main__":
    # small shapes consistent with the module defaults
    # (num_spectrogram_bins=256, filters=64, reduction_ratio=1/16 -> hidden 4)
    B, T, F_BINS = 4, 16, 256
    FILTERS, ORDER = 64, 4
    HIDDEN = max(1, int(FILTERS * (1.0 / 16.0)))              # = 4
    N_CLS = 10
    SAMPLE_RATE = 16000

    key = jax.random.PRNGKey(0)
    ks = jax.random.split(key, 9)

    # non-negative magnitude spectrogram, NCHW
    x = jax.random.uniform(ks[0], (B, 1, T, F_BINS), jnp.float32)

    params = make_degram_params(ks[1:], F_BINS, FILTERS, ORDER, HIDDEN,
                                N_CLS, SAMPLE_RATE)
    out = degram_forward(x, params, n_classes=N_CLS)
    jax.block_until_ready(out)
    assert out.shape == (B, N_CLS)
    assert bool(jnp.all(jnp.isfinite(out)))
    print("KERNEL_OK")
</pallas_src>

<mosaic_0001>
module attributes {stable_mosaic.version = 11 : i64} {
  func.func @degram_kernel(%arg0: i32, %arg1: memref<2x1x16x256xf32, #tpu.memory_space<vmem>>, %arg2: memref<256x128xf32, #tpu.memory_space<vmem>>, %arg3: memref<128x128xf32, #tpu.memory_space<vmem>>, %arg4: memref<128x128xf32, #tpu.memory_space<vmem>>, %arg5: memref<4x128xf32, #tpu.memory_space<vmem>>, %arg6: memref<1xf32, #tpu.memory_space<smem>>, %arg7: memref<128x128xf32, #tpu.memory_space<vmem>>, %arg8: memref<1x2x128xf32, #tpu.memory_space<vmem>>) attributes {dimension_semantics = [#tpu.dimension_semantics<parallel>], iteration_bounds = array<i64: 2>, scalar_prefetch = 0 : i64, scratch_operands = 0 : i64, tpu.core_type = #tpu.core_type<tc>, window_params = [{transform_indices = @transform_0, window_bounds = array<i64: 2, 1, 16, 256>}, {pipeline_mode = #tpu.pipeline_mode<synchronous>, transform_indices = @transform_1, window_bounds = array<i64: 256, 128>}, {pipeline_mode = #tpu.pipeline_mode<synchronous>, transform_indices = @transform_2, window_bounds = array<i64: 128, 128>}, {pipeline_mode = #tpu.pipeline_mode<synchronous>, transform_indices = @transform_3, window_bounds = array<i64: 128, 128>}, {pipeline_mode = #tpu.pipeline_mode<synchronous>, transform_indices = @transform_4, window_bounds = array<i64: 4, 128>}, {transform_indices = @transform_5, window_bounds = array<i64: 1>}, {pipeline_mode = #tpu.pipeline_mode<synchronous>, transform_indices = @transform_6, window_bounds = array<i64: 128, 128>}, {transform_indices = @transform_7, window_bounds = array<i64: 1, 2, 128>}]} {
    %c0 = arith.constant 0 : index
    %c0_0 = arith.constant 0 : index
    %c0_1 = arith.constant 0 : index
    %c0_2 = arith.constant 0 : index
    %0 = vector.load %arg1[%c0, %c0_0, %c0_1, %c0_2] : memref<2x1x16x256xf32, #tpu.memory_space<vmem>>, vector<2x1x16x256xf32>
    %1 = vector.shape_cast %0 : vector<2x1x16x256xf32> to vector<2x16x256xf32>
    %2 = vector.shape_cast %1 : vector<2x16x256xf32> to vector<32x256xf32>
    %c0_3 = arith.constant 0 : index
    %c0_4 = arith.constant 0 : index
    %3 = vector.load %arg2[%c0_3, %c0_4] : memref<256x128xf32, #tpu.memory_space<vmem>>, vector<256x128xf32>
    %cst = arith.constant dense<0.000000e+00> : vector<32x128xf32>
    %4 = tpu.matmul %2, %3, %cst {dimension_numbers = #tpu.dot_dimension_numbers<[1], [0], [0], [1], [0, 0, 1, 1], [], []>} : vector<32x256xf32>, vector<256x128xf32>, vector<32x128xf32> -> vector<32x128xf32>
    %cst_5 = arith.constant 1.000000e-07 : f32
    %5 = vector.broadcast %cst_5 : f32 to vector<32x128xf32>
    %6 = arith.addf %4, %5 : vector<32x128xf32>
    %7 = math.log %6 : vector<32x128xf32>
    %8 = vector.shape_cast %7 : vector<32x128xf32> to vector<2x16x128xf32>
    %c0_6 = arith.constant 0 : index
    %c0_7 = arith.constant 0 : index
    %9 = vector.load %arg5[%c0_6, %c0_7] : memref<4x128xf32, #tpu.memory_space<vmem>>, vector<4x128xf32>
    %10 = vector.extract_strided_slice %9 {offsets = [0, 0], sizes = [1, 128], strides = [1, 1]} : vector<4x128xf32> to vector<1x128xf32>
    %11 = vector.extract_strided_slice %9 {offsets = [1, 0], sizes = [1, 128], strides = [1, 1]} : vector<4x128xf32> to vector<1x128xf32>
    %12 = vector.extract_strided_slice %9 {offsets = [2, 0], sizes = [1, 128], strides = [1, 1]} : vector<4x128xf32> to vector<1x128xf32>
    %13 = vector.extract_strided_slice %9 {offsets = [3, 0], sizes = [1, 128], strides = [1, 1]} : vector<4x128xf32> to vector<1x128xf32>
    %c0_8 = arith.constant 0 : index
    %14 = memref.load %arg6[%c0_8] : memref<1xf32, #tpu.memory_space<smem>>
    %cst_9 = arith.constant dense<0.000000e+00> : vector<2x128xf32>
    %15 = vector.multi_reduction <add>, %8, %cst_9 [1] : vector<2x16x128xf32> to vector<2x128xf32>
    %cst_10 = arith.constant 1.600000e+01 : f32
    %16 = vector.broadcast %cst_10 : f32 to vector<2x128xf32>
    %17 = arith.divf %15, %16 : vector<2x128xf32>
    %c0_11 = arith.constant 0 : index
    %c0_12 = arith.constant 0 : index
    %18 = vector.load %arg3[%c0_11, %c0_12] : memref<128x128xf32, #tpu.memory_space<vmem>>, vector<128x128xf32>
    %cst_13 = arith.constant dense<0.000000e+00> : vector<2x128xf32>
    %19 = tpu.matmul %17, %18, %cst_13 {dimension_numbers = #tpu.dot_dimension_numbers<[1], [0], [0], [1], [0, 0, 1, 1], [], []>} : vector<2x128xf32>, vector<128x128xf32>, vector<2x128xf32> -> vector<2x128xf32>
    %20 = vector.broadcast %10 : vector<1x128xf32> to vector<2x128xf32>
    %21 = arith.addf %19, %20 : vector<2x128xf32>
    %cst_14 = arith.constant 0.000000e+00 : f32
    %22 = vector.broadcast %cst_14 : f32 to vector<2x128xf32>
    %23 = arith.maximumf %21, %22 : vector<2x128xf32>
    %c0_15 = arith.constant 0 : index
    %c0_16 = arith.constant 0 : index
    %24 = vector.load %arg4[%c0_15, %c0_16] : memref<128x128xf32, #tpu.memory_space<vmem>>, vector<128x128xf32>
    %cst_17 = arith.constant dense<0.000000e+00> : vector<2x128xf32>
    %25 = tpu.matmul %23, %24, %cst_17 {dimension_numbers = #tpu.dot_dimension_numbers<[1], [0], [0], [1], [0, 0, 1, 1], [], []>} : vector<2x128xf32>, vector<128x128xf32>, vector<2x128xf32> -> vector<2x128xf32>
    %26 = vector.broadcast %11 : vector<1x128xf32> to vector<2x128xf32>
    %27 = arith.addf %25, %26 : vector<2x128xf32>
    %28 = arith.negf %27 : vector<2x128xf32>
    %29 = math.exp %28 : vector<2x128xf32>
    %cst_18 = arith.constant 1.000000e+00 : f32
    %30 = vector.broadcast %cst_18 : f32 to vector<2x128xf32>
    %31 = arith.addf %30, %29 : vector<2x128xf32>
    %32 = arith.divf %30, %31 : vector<2x128xf32>
    %33 = vector.shape_cast %12 : vector<1x128xf32> to vector<1x1x128xf32>
    %34 = vector.broadcast %33 : vector<1x1x128xf32> to vector<2x16x128xf32>
    %35 = arith.mulf %8, %34 : vector<2x16x128xf32>
    %cst_19 = arith.constant dense<0.000000e+00> : vector<2x16xf32>
    %36 = vector.multi_reduction <add>, %35, %cst_19 [2] : vector<2x16x128xf32> to vector<2x16xf32>
    %37 = vector.shape_cast %36 : vector<2x16xf32> to vector<2x16x1xf32>
    %38 = vector.broadcast %14 : f32 to vector<2x16x1xf32>
    %39 = arith.addf %37, %38 : vector<2x16x1xf32>
    %40 = arith.negf %39 : vector<2x16x1xf32>
    %41 = math.exp %40 : vector<2x16x1xf32>
    %cst_20 = arith.constant 1.000000e+00 : f32
    %42 = vector.broadcast %cst_20 : f32 to vector<2x16x1xf32>
    %43 = arith.addf %42, %41 : vector<2x16x1xf32>
    %44 = arith.divf %42, %43 : vector<2x16x1xf32>
    %45 = vector.shape_cast %32 : vector<2x128xf32> to vector<2x1x128xf32>
    %46 = vector.broadcast %45 : vector<2x1x128xf32> to vector<2x16x128xf32>
    %47 = arith.mulf %8, %46 : vector<2x16x128xf32>
    %48 = vector.broadcast %44 : vector<2x16x1xf32> to vector<2x16x128xf32>
    %49 = arith.mulf %8, %48 : vector<2x16x128xf32>
    %50 = arith.maximumf %47, %49 : vector<2x16x128xf32>
    %cst_21 = arith.constant dense<0.000000e+00> : vector<2x128xf32>
    %51 = vector.multi_reduction <add>, %50, %cst_21 [1] : vector<2x16x128xf32> to vector<2x128xf32>
    %52 = vector.shape_cast %51 : vector<2x128xf32> to vector<2x1x128xf32>
    %cst_22 = arith.constant 1.600000e+01 : f32
    %53 = vector.broadcast %cst_22 : f32 to vector<2x1x128xf32>
    %54 = arith.divf %52, %53 : vector<2x1x128xf32>
    %55 = arith.mulf %50, %50 : vector<2x16x128xf32>
    %cst_23 = arith.constant dense<0.000000e+00> : vector<2x128xf32>
    %56 = vector.multi_reduction <add>, %55, %cst_23 [1] : vector<2x16x128xf32> to vector<2x128xf32>
    %57 = vector.shape_cast %56 : vector<2x128xf32> to vector<2x1x128xf32>
    %cst_24 = arith.constant 1.600000e+01 : f32
    %58 = vector.broadcast %cst_24 : f32 to vector<2x1x128xf32>
    %59 = arith.divf %57, %58 : vector<2x1x128xf32>
    %60 = arith.mulf %54, %54 : vector<2x1x128xf32>
    %61 = arith.subf %59, %60 : vector<2x1x128xf32>
    %cst_25 = arith.constant 0.000000e+00 : f32
    %62 = vector.broadcast %cst_25 : f32 to vector<2x1x128xf32>
    %63 = arith.maximumf %61, %62 : vector<2x1x128xf32>
    %64 = math.sqrt %63 : vector<2x1x128xf32>
    %cst_26 = arith.constant 1.000000e-07 : f32
    %65 = vector.broadcast %cst_26 : f32 to vector<2x1x128xf32>
    %66 = arith.addf %64, %65 : vector<2x1x128xf32>
    %67 = tpu.reciprocal %66 {approx = true} : vector<2x1x128xf32> -> vector<2x1x128xf32>
    %68 = vector.broadcast %54 : vector<2x1x128xf32> to vector<2x16x128xf32>
    %69 = arith.subf %50, %68 : vector<2x16x128xf32>
    %70 = vector.broadcast %67 : vector<2x1x128xf32> to vector<2x16x128xf32>
    %71 = arith.mulf %69, %70 : vector<2x16x128xf32>
    %cst_27 = arith.constant dense<0.000000e+00> : vector<2x128xf32>
    %72 = vector.multi_reduction <add>, %71, %cst_27 [1] : vector<2x16x128xf32> to vector<2x128xf32>
    %cst_28 = arith.constant 1.600000e+01 : f32
    %73 = vector.broadcast %cst_28 : f32 to vector<2x128xf32>
    %74 = arith.divf %72, %73 : vector<2x128xf32>
    %c0_29 = arith.constant 0 : index
    %c0_30 = arith.constant 0 : index
    %75 = vector.load %arg7[%c0_29, %c0_30] : memref<128x128xf32, #tpu.memory_space<vmem>>, vector<128x128xf32>
    %cst_31 = arith.constant dense<0.000000e+00> : vector<2x128xf32>
    %76 = tpu.matmul %74, %75, %cst_31 {dimension_numbers = #tpu.dot_dimension_numbers<[1], [0], [0], [1], [0, 0, 1, 1], [], []>} : vector<2x128xf32>, vector<128x128xf32>, vector<2x128xf32> -> vector<2x128xf32>
    %77 = vector.broadcast %13 : vector<1x128xf32> to vector<2x128xf32>
    %78 = arith.addf %76, %77 : vector<2x128xf32>
    %c0_32 = arith.constant 0 : index
    %c0_33 = arith.constant 0 : index
    %c0_34 = arith.constant 0 : index
    %79 = vector.load %arg8[%c0_32, %c0_33, %c0_34] : memref<1x2x128xf32, #tpu.memory_space<vmem>>, vector<1x2x128xf32>
    %80 = vector.shape_cast %79 : vector<1x2x128xf32> to vector<2x128xf32>
    %81 = vector.shape_cast %78 : vector<2x128xf32> to vector<1x2x128xf32>
    tpu.vector_store %arg8[%c0_32, %c0_33, %c0_34], %81 {strides = array<i32>} : memref<1x2x128xf32, #tpu.memory_space<vmem>>, vector<1x2x128xf32>,
    return
  }
  func.func @transform_0(%arg0: i32) -> (i32, i32, i32, i32) {
    %c0_i32 = arith.constant 0 : i32
    %c0_i32_0 = arith.constant 0 : i32
    %c0_i32_1 = arith.constant 0 : i32
    %c0_i32_2 = arith.constant 0 : i32
    return %arg0, %c0_i32, %c0_i32_0, %c0_i32_1 : i32, i32, i32, i32
  }
  func.func @transform_1(%arg0: i32) -> (i32, i32) {
    %c0_i32 = arith.constant 0 : i32
    %c0_i32_0 = arith.constant 0 : i32
    %c0_i32_1 = arith.constant 0 : i32
    return %c0_i32, %c0_i32_0 : i32, i32
  }
  func.func @transform_2(%arg0: i32) -> (i32, i32) {
    %c0_i32 = arith.constant 0 : i32
    %c0_i32_0 = arith.constant 0 : i32
    %c0_i32_1 = arith.constant 0 : i32
    return %c0_i32, %c0_i32_0 : i32, i32
  }
  func.func @transform_3(%arg0: i32) -> (i32, i32) {
    %c0_i32 = arith.constant 0 : i32
    %c0_i32_0 = arith.constant 0 : i32
    %c0_i32_1 = arith.constant 0 : i32
    return %c0_i32, %c0_i32_0 : i32, i32
  }
  func.func @transform_4(%arg0: i32) -> (i32, i32) {
    %c0_i32 = arith.constant 0 : i32
    %c0_i32_0 = arith.constant 0 : i32
    %c0_i32_1 = arith.constant 0 : i32
    return %c0_i32, %c0_i32_0 : i32, i32
  }
  func.func @transform_5(%arg0: i32) -> i32 {
    %c0_i32 = arith.constant 0 : i32
    %c0_i32_0 = arith.constant 0 : i32
    return %c0_i32 : i32
  }
  func.func @transform_6(%arg0: i32) -> (i32, i32) {
    %c0_i32 = arith.constant 0 : i32
    %c0_i32_0 = arith.constant 0 : i32
    %c0_i32_1 = arith.constant 0 : i32
    return %c0_i32, %c0_i32_0 : i32, i32
  }
  func.func @transform_7(%arg0: i32) -> (i32, i32, i32) {
    %c0_i32 = arith.constant 0 : i32
    %c0_i32_0 = arith.constant 0 : i32
    %c0_i32_1 = arith.constant 0 : i32
    return %arg0, %c0_i32, %c0_i32_0 : i32, i32, i32
  }
}

</mosaic_0001>

<bundles_post_ra>
// kernel: tpu_custom_call.1
= control target key start
LH: loop header
LB: loop body
LE: loop exit
PB: predicated region body
PF: predicated region fallthrough
CT: control target
= control target key end

     0   :  { %s2231_s0 = inlined_call_operand.hbm [shape: f32[4,1,16,256], index: 0, kind: input, shape index: {}]   ;;  %s2232_s1 = inlined_call_operand.hbm [shape: f32[256,128], index: 1, kind: input, shape index: {}]   ;;  %s2233_s2 = inlined_call_operand.hbm [shape: f32[128,128], index: 2, kind: input, shape index: {}]   ;;  %s2234_s3 = inlined_call_operand.hbm [shape: f32[128,128], index: 3, kind: input, shape index: {}]   ;;  %s2235_s4 = inlined_call_operand.vmem [shape: f32[4,128], index: 4, kind: input, shape index: {}]   ;;  %s2236_s5 = inlined_call_operand.<no memory space> [shape: f32[1], index: 5, kind: input, shape index: {}]   ;;  %s2237_s6 = inlined_call_operand.hbm [shape: f32[128,128], index: 6, kind: input, shape index: {}]   ;;  %s2238_s7 = inlined_call_operand.hbm [shape: f32[2,2,128], index: 7, kind: output, shape index: {}]  }
   0x1   :  { %12 = sst [smem:[#allocation2]] %s2236_s5 }
   0x2   :  { %13 = vsyncpa [#allocation4], 0 }
   0x3   :  { %15 = vsyncpa [#allocation4 + $0x1], 0 }
   0x4   :  { %16 = vsyncpa [#allocation7], 0 }
   0x5   :  { %17 = vsyncpa [#allocation10], 0 }
   0x6   :  { %18 = vsyncpa [#allocation5], 0 }
   0x7   :  { %20 = vsyncpa [#allocation5 + $0x1], 0  ;;  %s1832_s26 = smov 0   ;;  %s1834_s27 = smov 0  }
   0x8   :  { %s1836_s28 = smov 0   ;;  %s1838_s29 = smov 0  }
   0x9 LB: > { %s1853_s5 = sadd.s32 4294967295, %s1773_s29   ;;  %s1093_s30 = sadd.s32 4294967294, %s1773_s29   ;;  %s1773_s29 = sphi %s1838_s29, %s2261_s29   ;;  %s1769_s28 = sphi %s1836_s28, %s2260_s28   ;;  %s1765_s27 = sphi %s1834_s27, %s2259_s27   ;;  %s1761_s26 = sphi %s1832_s26, %s2258_s26  }
   0xa   : > { %p46_p0 = scmp.ne.s32.totalorder %s1765_s27, %s1761_s26  ;;  %p2239_p1 = scmp.eq.s32.totalorder %s1853_s5, 0 }
   0xb   : > { %p202_p3 = scmp.eq.s32.totalorder %s1093_s30, 1  ;;  %p1094_p5 = scmp.ge.s32.totalorder %s1773_s29, 1 }
   0xc   : > { %p1862_p4 = por %p2239_p1, %p46_p0  ;;  %p209_p7 = scmp.lt.s32.totalorder %s1773_s29, 3 }
   0xd   : > { %p1867_p6 = por %p202_p3, %p46_p0  ;;  %s1775_s11 = smov [#allocation6]  }
   0xe   : > { %s2242_s8 = scalar_select %p1862_p4, 1, 0 }
   0xf   : > { %s2243_s9 = scalar_select %p1867_p6, 1, 0 }
  0x10   : > { %p1872_p8 = pnand %p1094_p5, %p209_p7  ;;  %s221_s12 = sshll.u32 %s1775_s11, 4  ;;  %s1876_s12 = int_to_ptr.vmem [resolvable:$true] %s221_s12 }
  0x11   : > { %s1776_s14 = smov [#allocation9]   ;;  %s1777_s16 = smov [#allocation8]  }
  0x12   : > { %s2244_s10 = scalar_select %p1872_p8, 1, 0 }
  0x13   : > { %p1446_p9 = pneg %p1872_p8  ;;  %s247_s15 = sshll.u32 %s1776_s14, 4  ;;  %s1887_s15 = int_to_ptr.vmem [resolvable:$true] %s247_s15 }
  0x14   : > { %s1889_s17 = sshll.u32 %s1777_s16, 4  ;;  %s1557_s20 = scalar_lea.hbm %s2232_s1, 4096  ;;  %s235_s17 = int_to_ptr.vmem [resolvable:$true] %s1889_s17 }
  0x15   : > { %p1883_p11 = pnand %p1446_p9, %p2239_p1  ;;  %p1558_p12 = scmp.ne.s32.totalorder %s2232_s1, %s1557_s20 }
  0x16   : > { %p1564_p5 = scmp.lt.u32.totalorder %s1557_s20, %s2232_s1 }
  0x17   : > { %p1899_p13 = pneg %p1883_p11 }
  0x19   : > { %p1560_p0 = pnand %p1899_p13, %p1558_p12 }
  0x1b   : > { %p1561_p3 = pneg %p1560_p0 }
  0x1d   : > { %p1566_p7 = pnand %p1564_p5, %p1561_p3 }
  0x1f   : > { %1569 = shalt.err (!%p1566_p7)
}
  0x20   : > { %s1570_s30 = scalar_lea.vmem %s1876_s12, 4096  ;;  %p1578_p2 = scmp.lt.s32.totalorder %s1876_s12, %s1876_s12 }
  0x21   : > { %p1571_p9 = scmp.ne.s32.totalorder %s1876_s12, %s1570_s30  ;;  %p1579_p6 = scmp.lt.s32.totalorder %s1570_s30, %s1570_s30 }
  0x23   : > { %p1573_p10 = pnand %p1571_p9, %p1899_p13  ;;  %p1580_p12 = por %p1579_p6, %p1578_p2 }
  0x25   : > { %p1574_p1 = pneg %p1573_p10 }
  0x27   : > { %p1581_p0 = pnand %p1580_p12, %p1574_p1 }
  0x29   : > { %1584 = shalt.err (!%p1581_p0)
}
  0x2a   : > { %s1778_s11 = smov 128   ;;  %s1779_s14 = smov 8  }
  0x2b   : > { %1449 = dma.hbm_to_vmem [thread:$0]  (!%p1883_p11), %s2232_s1, 4096, %s1876_s12, [#allocation7], %s1778_s11, %s1778_s11, %s1779_s14  }
  0x2c   : > { %s1585_s21 = scalar_lea.hbm %s2234_s3, 2048 }
  0x2d   : > { %p1586_p1 = scmp.ne.s32.totalorder %s2234_s3, %s1585_s21  ;;  %p1592_p10 = scmp.lt.u32.totalorder %s1585_s21, %s2234_s3 }
  0x2f   : > { %p1588_p2 = pnand %p1586_p1, %p1899_p13 }
  0x31   : > { %p1589_p6 = pneg %p1588_p2 }
  0x33   : > { %p1594_p3 = pnand %p1592_p10, %p1589_p6 }
  0x35   : > { %1597 = shalt.err (!%p1594_p3)
}
  0x36   : > { %s1598_s12 = scalar_lea.vmem %s1887_s15, 2048  ;;  %p1606_p12 = scmp.lt.s32.totalorder %s1887_s15, %s1887_s15 }
  0x37   : > { %p1599_p5 = scmp.ne.s32.totalorder %s1887_s15, %s1598_s12  ;;  %p1607_p0 = scmp.lt.s32.totalorder %s1598_s12, %s1598_s12 }
  0x39   : > { %p1601_p7 = pnand %p1599_p5, %p1899_p13  ;;  %p1608_p1 = por %p1607_p0, %p1606_p12 }
  0x3b   : > { %p1602_p9 = pneg %p1601_p7 }
  0x3d   : > { %p1609_p2 = pnand %p1608_p1, %p1602_p9 }
  0x3f   : > { %1612 = shalt.err (!%p1609_p2)
}
  0x40   : > { %1455 = dma.hbm_to_vmem [thread:$0]  (!%p1883_p11), %s2234_s3, 2048, %s1887_s15, [#allocation10], %s1778_s11, %s1778_s11, %s1779_s14  }
  0x41   : > { %s1613_s21 = scalar_lea.hbm %s2233_s2, 2048 }
  0x42   : > { %p1614_p6 = scmp.ne.s32.totalorder %s2233_s2, %s1613_s21  ;;  %p1620_p5 = scmp.lt.u32.totalorder %s1613_s21, %s2233_s2 }
  0x44   : > { %p1616_p10 = pnand %p1614_p6, %p1899_p13 }
  0x46   : > { %p1617_p3 = pneg %p1616_p10 }
  0x48   : > { %p1622_p7 = pnand %p1620_p5, %p1617_p3 }
  0x4a   : > { %1625 = shalt.err (!%p1622_p7)
}
  0x4b   : > { %s1626_s12 = scalar_lea.vmem %s235_s17, 2048  ;;  %p1634_p1 = scmp.lt.s32.totalorder %s235_s17, %s235_s17 }
  0x4c   : > { %p1627_p9 = scmp.ne.s32.totalorder %s235_s17, %s1626_s12  ;;  %p1635_p2 = scmp.lt.s32.totalorder %s1626_s12, %s1626_s12 }
  0x4e   : > { %p1629_p12 = pnand %p1627_p9, %p1899_p13  ;;  %p1636_p4 = por %p1635_p2, %p1634_p1 }
  0x50   : > { %p1630_p0 = pneg %p1629_p12 }
  0x52   : > { %p1637_p8 = pnand %p1636_p4, %p1630_p0 }
  0x54   : > { %1640 = shalt.err (!%p1637_p8)
}
  0x55   : > { %1452 = dma.hbm_to_vmem [thread:$0]  (!%p1883_p11), %s2233_s2, 2048, %s235_s17, [#allocation7], %s1778_s11, %s1778_s11, %s1779_s14  }
  0x56   : > { %s1780_s18 = smov [#allocation11]   ;;  %s1641_s22 = scalar_lea.hbm %s2237_s6, 2048 }
  0x57   : > { %s266_s19 = sshll.u32 %s1780_s18, 4  ;;  %p1642_p4 = scmp.ne.s32.totalorder %s2237_s6, %s1641_s22  ;;  %s267_s19 = int_to_ptr.vmem [resolvable:$true] %s266_s19 }
  0x58   : > { %p1648_p10 = scmp.lt.u32.totalorder %s1641_s22, %s2237_s6 }
  0x59   : > { %p1644_p8 = pnand %p1642_p4, %p1899_p13 }
  0x5b   : > { %p1645_p6 = pneg %p1644_p8 }
  0x5d   : > { %p1650_p3 = pnand %p1648_p10, %p1645_p6 }
  0x5f   : > { %1653 = shalt.err (!%p1650_p3)
}
  0x60   : > { %s1654_s17 = scalar_lea.vmem %s267_s19, 2048  ;;  %p1662_p12 = scmp.lt.s32.totalorder %s267_s19, %s267_s19 }
  0x61   : > { %p1655_p5 = scmp.ne.s32.totalorder %s267_s19, %s1654_s17  ;;  %p1663_p0 = scmp.lt.s32.totalorder %s1654_s17, %s1654_s17 }
  0x63   : > { %p1657_p7 = pnand %p1655_p5, %p1899_p13  ;;  %p1664_p1 = por %p1663_p0, %p1662_p12 }
  0x65   : > { %p1658_p9 = pneg %p1657_p7 }
  0x67   : > { %p1665_p2 = pnand %p1664_p1, %p1658_p9 }
  0x69   : > { %1668 = shalt.err (!%p1665_p2)
}
  0x6a   : > { %1458 = dma.hbm_to_vmem [thread:$0]  (!%p1883_p11), %s2237_s6, 2048, %s267_s19, [#allocation10], %s1778_s11, %s1778_s11, %s1779_s14  }
  0x6b   : > { %s1993_s23 = sadd.s32 1, %s1773_s29   ;;  %s33_s13 = sadd.s32 1, %s1769_s28 }
  0x6c   : > { %s30_s18 = ssub.s32 %s1773_s29, %s1993_s23  ;;  %p40_p13 = scmp.ne.s32.totalorder %s1769_s28, %s1765_s27 }
  0x6d   : > { %p31_p4 = scmp.eq.s32.totalorder %s30_s18, 0  ;;  %p41_p8 = scmp.eq.s32.totalorder %s1773_s29, 0 }
  0x6e   : > { %p2247_p6 = scmp.eq.s32.totalorder %s1853_s5, 1  ;;  %p1471_p3 = scmp.lt.s32.totalorder %s1773_s29, 2 }
  0x6f   : > { %s2009_s21 = scalar_select %p31_p4, %s1769_s28, %s33_s13  }
  0x70   : > { %p2003_p10 = por %p2247_p6, %p40_p13  ;;  %p42_p5 = por %p41_p8, %p40_p13 }
  0x71   : > { %s280_s22 = sand.u32 1, %s1769_s28   ;;  %s1121_s11 = sshll.u32 %s1773_s29, 10 }
  0x72   : > { %s1100_s24 = sshll.u32 %s280_s22, 6  ;;  %s2016_s25 = scalar_lea.hbm %s2231_s0, %s1121_s11 }
  0x73   : > { %s284_s30 = scalar_lea.vmem [#allocation3], %s1100_s24  ;;  %p2020_p11 = pnand %p1471_p3, %p42_p5 }
  0x74   : > { %s292_s12 = sshll.u32 %s284_s30, 4  ;;  %s2024_s15 = scalar_lea.sflag [#allocation4], %s280_s22  ;;  %s2018_s12 = int_to_ptr.vmem [resolvable:$true] %s292_s12 }
  0x75   : > { %s1669_s16 = scalar_lea.hbm %s2016_s25, 1024  ;;  %p1671_p9 = pneg %p2020_p11 }
  0x76   : > { %p1670_p7 = scmp.ne.s32.totalorder %s2016_s25, %s1669_s16  ;;  %s1674_s24 = scalar_lea.hbm %s2231_s0, 2048 }
  0x77   : > { %p1675_p1 = scmp.lt.u32.totalorder %s2016_s25, %s2231_s0  ;;  %p1676_p2 = scmp.lt.u32.totalorder %s1674_s24, %s1669_s16 }
  0x78   : > { %p1672_p12 = pnand %p1671_p9, %p1670_p7  ;;  %p1678_p4 = scmp.lt.u32.totalorder %s1669_s16, %s2016_s25 }
  0x79   : > { %p1677_p13 = por %p1676_p2, %p1675_p1 }
  0x7a   : > { %p1673_p0 = pneg %p1672_p12 }
  0x7b   : > { %p1679_p8 = por %p1678_p4, %p1677_p13 }
  0x7d   : > { %p1680_p6 = pnand %p1679_p8, %p1673_p0 }
  0x7f   : > { %1683 = shalt.err (!%p1680_p6)
}
  0x80   : > { %s1684_s22 = scalar_lea.vmem %s2018_s12, 1024  ;;  %s1781_s19 = smov [#allocation3]  }
  0x81   : > { %p1685_p3 = scmp.ne.s32.totalorder %s2018_s12, %s1684_s22  ;;  %s1689_s30 = sshll.u32 %s1781_s19, 4  ;;  %s1690_s30 = int_to_ptr.vmem [resolvable:$false] %s1689_s30 }
  0x82   : > { %s1691_s13 = scalar_lea.vmem %s1690_s30, 2048  ;;  %p1692_p12 = scmp.lt.s32.totalorder %s2018_s12, %s1690_s30 }
  0x83   : > { %p1687_p5 = pnand %p1685_p3, %p1671_p9  ;;  %p1693_p1 = scmp.lt.s32.totalorder %s1691_s13, %s1684_s22 }
  0x85   : > { %p1688_p7 = pneg %p1687_p5  ;;  %p1694_p2 = por %p1693_p1, %p1692_p12 }
  0x87   : > { %p1695_p13 = pnand %p1694_p2, %p1688_p7 }
  0x89   : > { %1698 = shalt.err (!%p1695_p13)
}
  0x8a   : > { %s1782_s16 = smov 256   ;;  %s1783_s18 = smov 16  }
  0x8b   : > { %1462 = dma.hbm_to_vmem [thread:$0]  (!%p2020_p11), %s2016_s25, 1024, %s2018_s12, %s2024_s15, %s1782_s16, %s1782_s16, %s1783_s18  }
  0x8c   : > { %p2250_p9 = scmp.ne.s32.totalorder %s2244_s10, 0 }
  0x8d   : > { %s2055_s24 = sand.u32 (!%p2250_p9), 1, %s1765_s27   ;;  %p2251_p0 = scmp.ne.s32.totalorder (!%p2250_p9), %s2242_s8, 0 }
  0x8e   : > { %304 = sbr.rel (%p2250_p9) target bundleno = 1216 (0x4c0), region = 48  ;;  %s1105_s11 = sshll.u32 (!%p2250_p9), %s2055_s24, 6 }
  0x8f   : > { %s307_s14 = scalar_lea.sflag (!%p2250_p9), [#allocation4], %s2055_s24  ;;  %s2059_s22 = scalar_lea.vmem (!%p2250_p9), [#allocation3], %s1105_s11 }
  0x95   : > { %1744 = dma.done.wait (%p2251_p0), %s307_s14, 1024  }
  0x96   : > { %1746 = vsyncadd (%p2251_p0), %s307_s14, 4294966272  ;;  %p2252_p11 = scmp.eq.s32.totalorder %s1853_s5, 0 }
  0x98   : > { %1748 = dma.done.wait (%p2252_p11), [#allocation7], 6144   ;;  %p2253_p4 = pmov %p2252_p11 }
  0x9a   : > { %1750 = vsyncadd (%p2253_p4), [#allocation7], 4294961152  ;;  %p2254_p8 = pmov %p2253_p4 }
  0x9b   : > { %p2255_p6 = pmov %p2253_p4 }
  0x9c   : > { %1752 = dma.done.wait (%p2254_p8), [#allocation10], 4096  }
  0x9d   : > { %1754 = vsyncadd (%p2255_p6), [#allocation10], 4294963200  ;;  %v382_v0 = vld [vmem:[#allocation6 + $0x80] sm:$0xff]  ;;  %v383_v1 = vld [vmem:[#allocation6 + $0x88] sm:$0xff]  ;;  %v1784_v59 = vmov 0.0|0.0   ;;  %vm1785_vm0 = vmmov 0  }
  0x9e   : > { %v366_v2 = vld [vmem:[#allocation6] sm:$0xff]  ;;  %v1322_v3 = vpack.c.bf16 %v383_v1, %v382_v0  ;;  %v367_v4 = vld [vmem:[#allocation6 + $0x8] sm:$0xff]  ;;  %v384_v5 = vld [vmem:[#allocation6 + $0x90] sm:$0xff]  ;;  %1354 = vmatprep.subr.bf16.mxu1 %v1784_v59  ;;  %vm532_vm1 = vcmask 1041409   ;;  %s492_s25 = sld [smem:[#allocation2]]  ;;  %s1110_s12 = sshll.u32 %s2055_s24, 1 }
  0x9f   : > { %v385_v6 = vld [vmem:[#allocation6 + $0x98] sm:$0xff]  ;;  %v1324_v7 = vpack.c.bf16 %v367_v4, %v366_v2  ;;  %v368_v9 = vld [vmem:[#allocation6 + $0x10] sm:$0xff]  ;;  %v386_v11 = vld [vmem:[#allocation6 + $0xa0] sm:$0xff]  ;;  %s1117_s17 = sshll.u32 %s1853_s5, 5  ;;  %s356_s15 = scalar_lea.vmem [#allocation12], %s1110_s12 }
  0xa0   : > { %v1326_v8 = vpack.c.bf16 %v385_v6, %v384_v5  ;;  %v369_v10 = vld [vmem:[#allocation6 + $0x18] sm:$0xff]  ;;  %1323 = vmatprep.subr.bf16.mxu0 %v1322_v3  ;;  %v387_v12 = vld [vmem:[#allocation6 + $0xa8] sm:$0xff]  ;;  %v370_v15 = vld [vmem:[#allocation6 + $0x20] sm:$0xff]  ;;  %s985_s19 = sshll.u32 %s356_s15, 4  ;;  %s2187_s16 = scalar_lea.hbm %s2238_s7, %s1117_s17  ;;  %s2189_s19 = int_to_ptr.vmem [resolvable:$true] %s985_s19 }
  0xa1   : > { %1325 = vmatpush3.bf16.msra.mxu0 %v1324_v7  ;;  %v1328_v13 = vpack.c.bf16 %v369_v10, %v368_v9  ;;  %v1330_v14 = vpack.c.bf16 %v387_v12, %v386_v11  ;;  %v371_v16 = vld [vmem:[#allocation6 + $0x28] sm:$0xff]  ;;  %v388_v17 = vld [vmem:[#allocation6 + $0xb0] sm:$0xff]  ;;  %v389_v18 = vld [vmem:[#allocation6 + $0xb8] sm:$0xff]  ;;  %s972_s18 = scalar_lea.sflag [#allocation5], %s2055_s24  ;;  %s1699_s11 = scalar_lea.vmem %s2189_s19, 32 }
  0xa2   : > { %1327 = vmatprep.subr.bf16.mxu0 %v1326_v8  ;;  %v1332_v19 = vpack.c.bf16 %v371_v16, %v370_v15  ;;  %v1334_v20 = vpack.c.bf16 %v389_v18, %v388_v17  ;;  %v372_v21 = vld [vmem:[#allocation6 + $0x30] sm:$0xff]  ;;  %v373_v22 = vld [vmem:[#allocation6 + $0x38] sm:$0xff]  ;;  %v390_v23 = vld [vmem:[#allocation6 + $0xc0] sm:$0xff]  ;;  %p1700_p3 = scmp.ne.s32.totalorder %s2189_s19, %s1699_s11  ;;  %s1788_s5 = smov [#allocation12]  }
  0xa3   : > { %v391_v24 = vld [vmem:[#allocation6 + $0xc8] sm:$0xff]  ;;  %v1336_v26 = vpack.c.bf16 %v373_v22, %v372_v21  ;;  %v374_v28 = vld [vmem:[#allocation6 + $0x40] sm:$0xff]  ;;  %v392_v30 = vld [vmem:[#allocation6 + $0xd0] sm:$0xff]  ;;  %v526_v21 = vlaneseq  ;;  %s1703_s14 = sshll.u32 %s1788_s5, 4  ;;  %s1704_s14 = int_to_ptr.vmem [resolvable:$false] %s1703_s14 }
  0xa4   : > { %v359_v25 = vld [vmem:[%s2059_s22 + $0x8] sm:$0xff]  ;;  %v1338_v27 = vpack.c.bf16 %v391_v24, %v390_v23  ;;  %v393_v31 = vld [vmem:[#allocation6 + $0xd8] sm:$0xff]  ;;  %v376_v34 = vld [vmem:[#allocation6 + $0x50] sm:$0xff]  ;;  %p1701_p5 = pnand %p1700_p3, %p2003_p10  ;;  %p1706_p12 = scmp.lt.s32.totalorder %s2189_s19, %s1704_s14 }
  0xa5   : > { %1329 = vmatpush3.bf16.msra.mxu0 %v1328_v13  ;;  %462 = vmatprep.mubr.f32.mxu0 %v359_v25  ;;  %v375_v29 = vld [vmem:[#allocation6 + $0x48] sm:$0xff]  ;;  %v1342_v33 = vpack.c.bf16 %v393_v31, %v392_v30  ;;  %v377_v35 = vld [vmem:[#allocation6 + $0x58] sm:$0xff]  ;;  %v394_v36 = vld [vmem:[#allocation6 + $0xe0] sm:$0xff]  ;;  %v1786_v13 = vmov 0.0  }
  0xa6   : > { %1331 = vmatprep.subr.bf16.mxu0 %v1330_v14  ;;  %v1340_v32 = vpack.c.bf16 %v375_v29, %v374_v28  ;;  %v395_v37 = vld [vmem:[#allocation6 + $0xe8] sm:$0xff]  ;;  %v1344_v38 = vpack.c.bf16 %v377_v35, %v376_v34  ;;  %v378_v40 = vld [vmem:[#allocation6 + $0x60] sm:$0xff]  ;;  %v396_v42 = vld [vmem:[#allocation6 + $0xf0] sm:$0xff]  ;;  %1249 = vmatprep.mubr.msk.f32.mxu1 %vm1785_vm0, %v1786_v13  ;;  %p1702_p7 = pneg %p1701_p5 }
  0xa7   : > { %v1346_v39 = vpack.c.bf16 %v395_v37, %v394_v36  ;;  %v379_v41 = vld [vmem:[#allocation6 + $0x68] sm:$0xff]  ;;  %v397_v43 = vld [vmem:[#allocation6 + $0xf8] sm:$0xff]  ;;  %v380_v46 = vld [vmem:[#allocation6 + $0x70] sm:$0xff] }
  0xa8   : > { %v1348_v44 = vpack.c.bf16 %v379_v41, %v378_v40  ;;  %v1350_v45 = vpack.c.bf16 %v397_v43, %v396_v42  ;;  %v381_v47 = vld [vmem:[#allocation6 + $0x78] sm:$0xff]  ;;  %v358_v49 = vld [vmem:[%s2059_s22] sm:$0xff]  ;;  %v360_v51 = vld [vmem:[%s2059_s22 + $0x10] sm:$0xff] }
  0xa9   : > { %1333 = vmatpush3.bf16.msra.mxu0 %v1332_v19  ;;  %v1352_v48 = vpack.c.bf16 %v381_v47, %v380_v46  ;;  %v361_v50 = vld [vmem:[%s2059_s22 + $0x18] sm:$0xff]  ;;  %v363_v52 = vld [vmem:[%s2059_s22 + $0x28] sm:$0xff]  ;;  %v362_v53 = vld [vmem:[%s2059_s22 + $0x20] sm:$0xff] }
  0xaa   : > { %1335 = vmatprep.subr.bf16.mxu0 %v1334_v20  ;;  %v365_v54 = vld [vmem:[%s2059_s22 + $0x38] sm:$0xff]  ;;  %v364_v55 = vld [vmem:[%s2059_s22 + $0x30] sm:$0xff]  ;;  %v510_v56 = vld [vmem:[#allocation8] sm:$0xff]  ;;  %s1705_s22 = scalar_lea.vmem %s1704_s14, 64 }
  0xab   : > { %v511_v57 = vld [vmem:[#allocation8 + $0x8] sm:$0xff]  ;;  %v512_v60 = vld [vmem:[#allocation8 + $0x10] sm:$0xff]  ;;  %v513_v61 = vld [vmem:[#allocation8 + $0x18] sm:$0xff]  ;;  %p1707_p1 = scmp.lt.s32.totalorder %s1705_s22, %s1699_s11 }
  0xac   : > { %v1355_v58 = vpack.c.bf16 %v511_v57, %v510_v56  ;;  %v1358_v62 = vpack.c.bf16 %v513_v61, %v512_v60  ;;  %v514_v63 = vld [vmem:[#allocation8 + $0x20] sm:$0xff]  ;;  %v515_v0 = vld [vmem:[#allocation8 + $0x28] sm:$0xff]  ;;  %v516_v2 = vld [vmem:[#allocation8 + $0x30] sm:$0xff] }
  0xad   : > { %1337 = vmatpush3.bf16.msra.mxu0 %v1336_v26  ;;  %v1361_v1 = vpack.c.bf16 %v515_v0, %v514_v63  ;;  %v517_v3 = vld [vmem:[#allocation8 + $0x38] sm:$0xff]  ;;  %v518_v5 = vld [vmem:[#allocation8 + $0x40] sm:$0xff]  ;;  %v519_v6 = vld [vmem:[#allocation8 + $0x48] sm:$0xff]  ;;  %v2095_v26 = vshrl.u32 %v526_v21, 7  ;;  %p1708_p2 = por %p1707_p1, %p1706_p12 }
  0xae   : > { %1339 = vmatprep.subr.bf16.mxu0 %v1338_v27  ;;  %1356 = vmatpush3.bf16.msra.mxu1 %v1355_v58  ;;  %v1364_v4 = vpack.c.bf16 %v517_v3, %v516_v2  ;;  %v1367_v7 = vpack.c.bf16 %v519_v6, %v518_v5  ;;  %v520_v8 = vld [vmem:[#allocation8 + $0x50] sm:$0xff]  ;;  %v521_v9 = vld [vmem:[#allocation8 + $0x58] sm:$0xff]  ;;  %v522_v11 = vld [vmem:[#allocation8 + $0x60] sm:$0xff] }
  0xaf   : > { %1357 = vmatprep.subr.bf16.mxu1 %v1784_v59  ;;  %v1370_v10 = vpack.c.bf16 %v521_v9, %v520_v8  ;;  %v523_v12 = vld [vmem:[#allocation8 + $0x68] sm:$0xff]  ;;  %v524_v15 = vld [vmem:[#allocation8 + $0x70] sm:$0xff]  ;;  %v525_v16 = vld [vmem:[#allocation8 + $0x78] sm:$0xff]  ;;  %v704_v31 = vsub.s32 2, %v2095_v26  ;;  %p1709_p13 = pnand %p1708_p2, %p1702_p7 }
  0xb0   : > { %v1373_v14 = vpack.c.bf16 %v523_v12, %v522_v11  ;;  %v1376_v17 = vpack.c.bf16 %v525_v16, %v524_v15  ;;  %v2101_v34 = vld [vmem:[%s2235_s4] sm:$0xf]  ;;  %v607_v6 = vld [vmem:[#allocation9 + $0x8] sm:$0xff]  ;;  %v609_v9 = vld [vmem:[#allocation9 + $0x18] sm:$0xff] }
  0xb1   : > { %1341 = vmatpush3.bf16.msra.mxu0 %v1340_v32  ;;  %v705_v37 = vrot.slane %v2101_v34, %v704_v31  ;;  %v606_v5 = vld [vmem:[#allocation9] sm:$0xff]  ;;  %v611_v12 = vld [vmem:[#allocation9 + $0x28] sm:$0xff]  ;;  %v612_v15 = vld [vmem:[#allocation9 + $0x30] sm:$0xff] }
  0xb2   : > { %1343 = vmatprep.subr.bf16.mxu0 %v1342_v33  ;;  %1359 = vmatpush3.bf16.msra.mxu1 %v1358_v62  ;;  %v1379_v8 = vpack.c.bf16 %v607_v6, %v606_v5  ;;  %v610_v11 = vld [vmem:[#allocation9 + $0x20] sm:$0xff]  ;;  %v613_v16 = vld [vmem:[#allocation9 + $0x38] sm:$0xff]  ;;  %v624_v6 = vsub.s32 1, %v2095_v26 }
  0xb3   : > { %1360 = vmatprep.subr.bf16.mxu1 %v1784_v59  ;;  %v617_v21 = vld [vmem:[#allocation9 + $0x58] sm:$0xff] }
  0xb5   : > { %1345 = vmatpush3.bf16.msra.mxu0 %v1344_v38 }
  0xb6   : > { %1347 = vmatprep.subr.bf16.mxu0 %v1346_v39  ;;  %1362 = vmatpush3.bf16.msra.mxu1 %v1361_v1 }
  0xb7   : > { %1363 = vmatprep.subr.bf16.mxu1 %v1784_v59 }
  0xb9   : > { %1349 = vmatpush3.bf16.msra.mxu0 %v1348_v44 }
  0xba   : > { %1351 = vmatprep.subr.bf16.mxu0 %v1350_v45  ;;  %1365 = vmatpush3.bf16.msra.mxu1 %v1364_v4 }
  0xbb   : > { %1366 = vmatprep.subr.bf16.mxu1 %v1784_v59 }
  0xbd   : > { %1353 = vmatpush3.bf16.msra.mxu0 %v1352_v48 }
  0xbe   : > { %1378 = vmatprep.subr.bf16.mxu0 %v1784_v59  ;;  %1368 = vmatpush3.bf16.msra.mxu1 %v1367_v7  ;;  %v608_v7 = vld [vmem:[#allocation9 + $0x10] sm:$0xff] }
  0xbf   : > { %1369 = vmatprep.subr.bf16.mxu1 %v1784_v59 }
  0xc0   : > { %463 = vmatmul.mubr.f32.vlgmr.msra.gmra.mrb[0].mxu0 %v358_v49 }
  0xc1   : > { %467 = vmatprep.mubr.f32.mxu0 %v361_v50  ;;  %1380 = vmatpush3.bf16.msra.mxu0 %v1379_v8 }
  0xc2   : > { %1371 = vmatpush3.bf16.msra.mxu1 %v1370_v10  ;;  %v1382_v10 = vpack.c.bf16 %v609_v9, %v608_v7  ;;  %1381 = vmatprep.subr.bf16.mxu0 %v1784_v59 }
  0xc3   : > { %1372 = vmatprep.subr.bf16.mxu1 %v1784_v59 }
  0xc4   : > { %468 = vmatmul.mubr.f32.gmra.mrb[2].mxu0 %v360_v51 }
  0xc5   : > { %472 = vmatprep.mubr.f32.mxu0 %v363_v52  ;;  %1383 = vmatpush3.bf16.msra.mxu0 %v1382_v10 }
  0xc6   : > { %1374 = vmatpush3.bf16.msra.mxu1 %v1373_v14  ;;  %v1385_v14 = vpack.c.bf16 %v611_v12, %v610_v11  ;;  %1384 = vmatprep.subr.bf16.mxu0 %v1784_v59  ;;  %v625_v11 = vrot.slane %v2101_v34, %v624_v6 }
  0xc7   : > { %1375 = vmatprep.subr.bf16.mxu1 %v1784_v59 }
  0xc8   : > { %473 = vmatmul.mubr.f32.gmra.mrb[4].mxu0 %v362_v53 }
  0xc9   : > { %477 = vmatprep.mubr.f32.mxu0 %v365_v54  ;;  %1386 = vmatpush3.bf16.msra.mxu0 %v1385_v14 }
  0xca   : > { %1377 = vmatpush3.bf16.msra.mxu1 %v1376_v17  ;;  %v1388_v17 = vpack.c.bf16 %v613_v16, %v612_v15  ;;  %1387 = vmatprep.subr.bf16.mxu0 %v1784_v59 }
  0xcb   : > { %1402 = vmatprep.subr.bf16.mxu1 %v1784_v59 }
  0xcc   : > { %478 = vmatmul.mubr.f32.gmra.mrb[6].mxu0 %v364_v55 }
  0xcd   : > { %1284 = vmatprep.mubr.msk.f32.mxu0 %vm1785_vm0, %v1786_v13  ;;  %1389 = vmatpush3.bf16.msra.mxu0 %v1388_v17 }
  0xce   : > { %1390 = vmatprep.subr.bf16.mxu0 %v1784_v59 }
 0x193   : > { %v1154_v18 = vpop.f32.mrb[0].mxu0 }
 0x194   : > { %v1155_v19 = vpop.f32.mrb[1].mxu0 }
 0x195   : > { %v1156_v20 = vadd.f32 %v1155_v19, %v1154_v18  ;;  %v615_v18 = vld [vmem:[#allocation9 + $0x48] sm:$0xff] }
 0x197   : > { %v465_v22 = vadd.f32 1e-07, %v1156_v20  ;;  %v1157_v23 = vpop.f32.mrb[2].mxu0  ;;  %v616_v20 = vld [vmem:[#allocation9 + $0x50] sm:$0xff] }
 0x198   : > { %v1158_v24 = vpop.f32.mrb[3].mxu0 }
 0x199   : > { %1521 = vlog2.f32 %v465_v22  ;;  %v1159_v25 = vadd.f32 %v1158_v24, %v1157_v23  ;;  %v1394_v22 = vpack.c.bf16 %v617_v21, %v616_v20  ;;  %v618_v23 = vld [vmem:[#allocation9 + $0x60] sm:$0xff]  ;;  %v619_v24 = vld [vmem:[#allocation9 + $0x68] sm:$0xff] }
 0x19b   : > { %v470_v27 = vadd.f32 1e-07, %v1159_v25  ;;  %v1160_v28 = vpop.f32.mrb[4].mxu0  ;;  %v1397_v25 = vpack.c.bf16 %v619_v24, %v618_v23 }
 0x19c   : > { %v1161_v29 = vpop.f32.mrb[5].mxu0 }
 0x19d   : > { %1523 = vlog2.f32 %v470_v27  ;;  %v1162_v30 = vadd.f32 %v1161_v29, %v1160_v28  ;;  %v620_v27 = vld [vmem:[#allocation9 + $0x70] sm:$0xff]  ;;  %v621_v28 = vld [vmem:[#allocation9 + $0x78] sm:$0xff] }
 0x19e   : > { %v1400_v29 = vpack.c.bf16 %v621_v28, %v620_v27 }
 0x19f   : > { %v475_v32 = vadd.f32 1e-07, %v1162_v30  ;;  %v1163_v33 = vpop.f32.mrb[6].mxu0  ;;  %v2131_v30 = vsub.s32 0, %v2095_v26 }
 0x1a0   : > { %v1164_v35 = vpop.f32.mrb[7].mxu0 }
 0x1a1   : > { %1525 = vlog2.f32 %v475_v32  ;;  %v1165_v36 = vadd.f32 %v1164_v35, %v1163_v33  ;;  %v529_v31 = vrot.slane %v2101_v34, %v2131_v30 }
 0x1a3   : > { %v1522_v38 = vpop.eup %1521  ;;  %v480_v39 = vadd.f32 1e-07, %v1165_v36 }
 0x1a4   : > { %v2104_v40 = vmul.f32 0.6931472, %v1522_v38  ;;  %v877_v38 = vld [vmem:[#allocation11 + $0x8] sm:$0xff] }
 0x1a5   : > { %1527 = vlog2.f32 %v480_v39  ;;  %v878_v39 = vld [vmem:[#allocation11 + $0x10] sm:$0xff] }
 0x1a6   : > { %v706_v41 = vmul.f32 %v705_v37, %v2104_v40 }
 0x1a7   : > { %v1524_v42 = vpop.eup %1523 }
 0x1a8   : > { %v2107_v43 = vmul.f32 0.6931472, %v1524_v42  ;;  %710 = vadd.xlane.f32.xlu0 %v706_v41  ;;  %v879_v42 = vld [vmem:[#allocation11 + $0x18] sm:$0xff] }
 0x1aa   : > { %v493_v44 = vadd.f32 %v2107_v43, %v2104_v40  ;;  %v707_v45 = vmul.f32 %v705_v37, %v2107_v43 }
 0x1ab   : > { %v1526_v46 = vpop.eup %1525 }
 0x1ac   : > { %v2112_v47 = vmul.f32 0.6931472, %v1526_v46  ;;  %712 = vadd.xlane.f32.xlu0 %v707_v45  ;;  %v494_v48 = vrot.slane %v493_v44, 4  ;;  %v880_v45 = vld [vmem:[#allocation11 + $0x20] sm:$0xff]  ;;  %v881_v46 = vld [vmem:[#allocation11 + $0x28] sm:$0xff] }
 0x1ae   : > { %v708_v49 = vmul.f32 %v705_v37, %v2112_v47  ;;  %v495_v50 = vadd.f32 %v494_v48, %v493_v44  ;;  %v1406_v44 = vpack.c.bf16 %v879_v42, %v878_v39  ;;  %v1409_v48 = vpack.c.bf16 %v881_v46, %v880_v45 }
 0x1af   : > { %v1528_v51 = vpop.eup %1527 }
 0x1b0   : > { %v2115_v52 = vmul.f32 0.6931472, %v1528_v51  ;;  %714 = vadd.xlane.f32.xlu1 %v708_v49  ;;  %v496_v53 = vrot.slane %v495_v50, 2  ;;  %v882_v49 = vld [vmem:[#allocation11 + $0x30] sm:$0xff] }
 0x1b2   : > { %v500_v54 = vadd.f32 %v2115_v52, %v2112_v47  ;;  %v709_v55 = vmul.f32 %v705_v37, %v2115_v52  ;;  %v497_v56 = vadd.f32 %v496_v53, %v495_v50  ;;  %v876_v37 = vld [vmem:[#allocation11] sm:$0xff]  ;;  %v883_v50 = vld [vmem:[#allocation11 + $0x38] sm:$0xff] }
 0x1b3   : > { %v1403_v41 = vpack.c.bf16 %v877_v38, %v876_v37  ;;  %v1412_v51 = vpack.c.bf16 %v883_v50, %v882_v49  ;;  %v884_v53 = vld [vmem:[#allocation11 + $0x40] sm:$0xff] }
 0x1b4   : > { %716 = vadd.xlane.f32.xlu1 %v709_v55  ;;  %v501_v57 = vrot.slane %v500_v54, 4  ;;  %v498_v60 = vrot.slane %v497_v56, 1 }
 0x1b6   : > { %v502_v58 = vadd.f32 %v501_v57, %v500_v54  ;;  %v499_v63 = vadd.f32 %v498_v60, %v497_v56  ;;  %v885_v54 = vld [vmem:[#allocation11 + $0x48] sm:$0xff]  ;;  %v886_v56 = vld [vmem:[#allocation11 + $0x50] sm:$0xff]  ;;  %v887_v57 = vld [vmem:[#allocation11 + $0x58] sm:$0xff] }
 0x1b7   : > { %v1415_v55 = vpack.c.bf16 %v885_v54, %v884_v53  ;;  %v888_v60 = vld [vmem:[#allocation11 + $0x60] sm:$0xff] }
 0x1b8   : > { %v503_v61 = vrot.slane %v502_v58, 2  ;;  %v508_v2 = vmul.f32 0.0625, %v499_v63  ;;  %v890_v63 = vld [vmem:[#allocation11 + $0x70] sm:$0xff] }
 0x1ba   : > { %v504_v62 = vadd.f32 %v503_v61, %v502_v58  ;;  %v1418_v58 = vpack.c.bf16 %v887_v57, %v886_v56  ;;  %v889_v61 = vld [vmem:[#allocation11 + $0x68] sm:$0xff] }
 0x1bc   : > { %v505_v0 = vrot.slane %v504_v62, 1 }
 0x1be   : > { %v506_v1 = vadd.f32 %v505_v0, %v504_v62  ;;  %v1421_v62 = vpack.c.bf16 %v889_v61, %v888_v60  ;;  %v891_v0 = vld [vmem:[#allocation11 + $0x78] sm:$0xff] }
 0x1c0   : > { %v509_v3 = vmul.f32 0.0625, %v506_v1  ;;  %v1424_v1 = vpack.c.bf16 %v891_v0, %v890_v63 }
 0x1c2   : > { %v533_v4 = vsel %vm532_vm1, %v509_v3, %v508_v2 }
 0x1c3   : > { %1250 = vmatmul.mubr.f32.vlgmr.msra.gmra.mrb[0].mxu1 %v533_v4  ;;  %v718_v4 = vstv %s492_s25 }
 0x1c4   : > { %1319 = vmatprep.mubr.msk.f32.mxu1 %vm1785_vm0, %v1786_v13  ;;  %v614_v13 = vld [vmem:[#allocation9 + $0x40] sm:$0xff]  ;;  %1404 = vmatpush3.bf16.msra.mxu1 %v1403_v41 }
 0x1c5   : > { %v1391_v19 = vpack.c.bf16 %v615_v18, %v614_v13  ;;  %1405 = vmatprep.subr.bf16.mxu1 %v1784_v59 }
 0x1c7   : > { %1392 = vmatpush3.bf16.msra.mxu0 %v1391_v19 }
 0x1c8   : > { %1393 = vmatprep.subr.bf16.mxu0 %v1784_v59  ;;  %1407 = vmatpush3.bf16.msra.mxu1 %v1406_v44 }
 0x1c9   : > { %1408 = vmatprep.subr.bf16.mxu1 %v1784_v59 }
 0x1cb   : > { %1395 = vmatpush3.bf16.msra.mxu0 %v1394_v22 }
 0x1cc   : > { %1396 = vmatprep.subr.bf16.mxu0 %v1784_v59  ;;  %1410 = vmatpush3.bf16.msra.mxu1 %v1409_v48 }
 0x1cd   : > { %1411 = vmatprep.subr.bf16.mxu1 %v1784_v59 }
 0x1cf   : > { %1398 = vmatpush3.bf16.msra.mxu0 %v1397_v25 }
 0x1d0   : > { %1399 = vmatprep.subr.bf16.mxu0 %v1784_v59  ;;  %1413 = vmatpush3.bf16.msra.mxu1 %v1412_v51 }
 0x1d1   : > { %1414 = vmatprep.subr.bf16.mxu1 %v1784_v59 }
 0x1d3   : > { %1401 = vmatpush3.bf16.msra.mxu0 %v1400_v29  ;;  %v1787_v29 = vmov 1966171168  }
 0x1d4   : > { %1416 = vmatpush3.bf16.msra.mxu1 %v1415_v55 }
 0x1d5   : > { %1417 = vmatprep.subr.bf16.mxu1 %v1784_v59 }
 0x1d8   : > { %1419 = vmatpush3.bf16.msra.mxu1 %v1418_v58 }
 0x1d9   : > { %1420 = vmatprep.subr.bf16.mxu1 %v1784_v59 }
 0x1dc   : > { %1422 = vmatpush3.bf16.msra.mxu1 %v1421_v62 }
 0x1dd   : > { %1423 = vmatprep.subr.bf16.mxu1 %v1784_v59 }
 0x1e0   : > { %1425 = vmatpush3.bf16.msra.mxu1 %v1424_v1 }
 0x235   : > { %v711_v2 = vpop.xlane.xlu0 %710 }
 0x236   : > { %v719_v7 = vadd.f32 %v718_v4, %v711_v2 }
 0x238   : > { %v1112_v12 = vmul.f32 -1.442695, %v719_v7 }
 0x239   : > { %v713_v5 = vpop.xlane.xlu0 %712 }
 0x23a   : > { %v720_v8 = vadd.f32 %v718_v4, %v713_v5  ;;  %1529 = vpow2.f32 %v1112_v12 }
 0x23c   : > { %v1113_v15 = vmul.f32 -1.442695, %v720_v8 }
 0x23d   : > { %v715_v3 = vpop.xlane.xlu1 %714 }
 0x23e   : > { %v721_v10 = vadd.f32 %v718_v4, %v715_v3  ;;  %1531 = vpow2.f32 %v1113_v15 }
 0x240   : > { %v1114_v16 = vmul.f32 -1.442695, %v721_v10 }
 0x241   : > { %v717_v9 = vpop.xlane.xlu1 %716 }
 0x242   : > { %v722_v14 = vadd.f32 %v718_v4, %v717_v9  ;;  %1533 = vpow2.f32 %v1114_v16 }
 0x244   : > { %v1115_v18 = vmul.f32 -1.442695, %v722_v14  ;;  %v1530_v20 = vpop.eup %1529 }
 0x245   : > { %v735_v25 = vadd.f32 1.0, %v1530_v20 }
 0x248   : > { %v1532_v21 = vpop.eup %1531 }
 0x249   : > { %v736_v28 = vadd.f32 1.0, %v1532_v21 }
 0x24c   : > { %v1534_v22 = vpop.eup %1533 }
 0x296   : > { %v601_v32 = vpop.f32.mrb[0].mxu1 }
 0x297   : > { %v602_v33 = vadd.f32 %v601_v32, %v529_v31  ;;  %v1251_v35 = vpop.f32.mrb[1].mxu1  ;;  %v749_v31 = vunpack.c.l.s4 %v1787_v29  ;;  %v737_v32 = vadd.f32 1.0, %v1534_v22 }
 0x299   : > { %v605_v36 = vmax.f32 %v602_v33, 0.0  ;;  %v750_v35 = vunpack.c.0.s8 %v749_v31 }
 0x29b   : > { %1285 = vmatmul.mubr.f32.vlgmr.msra.gmra.mrb[8].mxu0 %v605_v36  ;;  %v753_v36 = vsub.s32 %v750_v35, %v2095_v26 }
 0x36e   : > { %v692_v17 = vpop.f32.mrb[8].mxu0 }
 0x36f   : > { %v693_v59 = vadd.f32 %v692_v17, %v625_v11  ;;  %v1286_v13 = vpop.f32.mrb[9].mxu0 }
 0x371   : > { %v1111_v19 = vmul.f32 -1.442695, %v693_v59 }
 0x373   : > { %1535 = vpow2.f32 %v1111_v19 }
 0x374   : > { %1537 = vpow2.f32 %v1115_v18 }
 0x37d   : > { %v1536_v23 = vpop.eup %1535 }
 0x37e   : > { %v1538_v24 = vpop.eup %1537  ;;  %v699_v27 = vadd.f32 1.0, %v1536_v23 }
 0x37f   : > { %v738_v33 = vadd.f32 1.0, %v1538_v24 }
 0x380   : > { %1539 = vrcp.f32 %v699_v27 }
 0x381   : > { %1541 = vrcp.f32 %v735_v25 }
 0x382   : > { %1543 = vrcp.f32 %v736_v28 }
 0x383   : > { %1545 = vrcp.f32 %v737_v32 }
 0x384   : > { %1547 = vrcp.f32 %v738_v33 }
 0x38a   : > { %v1540_v37 = vpop.eup %1539 }
 0x38b   : > { %v754_v38 = vrot.slane %v1540_v37, %v753_v36  ;;  %v1542_v39 = vpop.eup %1541 }
 0x38c   : > { %v1544_v41 = vpop.eup %1543  ;;  %v784_v50 = vmul.f32 %v1542_v39, %v2104_v40 }
 0x38d   : > { %v755_v42 = vcombine.high %v754_v38, %v754_v38  ;;  %v762_v44 = vrot.slane %v754_v38, %v753_v36  ;;  %v1546_v45 = vpop.eup %1545  ;;  %v785_v51 = vmul.f32 %v1544_v41, %v2107_v43 }
 0x38e   : > { %v1548_v46 = vpop.eup %1547  ;;  %v786_v56 = vmul.f32 %v1546_v45, %v2112_v47 }
 0x38f   : > { %v769_v48 = vrot.slane %v755_v42, %v753_v36  ;;  %v773_v49 = vrot.slane %v762_v44, %v2131_v30  ;;  %v787_v57 = vmul.f32 %v1548_v46, %v2115_v52 }
 0x391   : > { %v777_v53 = vrot.slane %v769_v48, %v2131_v30  ;;  %v780_v54 = vmul.f32 %v773_v49, %v2104_v40  ;;  %v781_v55 = vmul.f32 %v773_v49, %v2107_v43 }
 0x393   : > { %v782_v58 = vmul.f32 %v777_v53, %v2112_v47  ;;  %v783_v60 = vmul.f32 %v777_v53, %v2115_v52  ;;  %v2155_v61 = vmax.f32 %v780_v54, %v784_v50  ;;  %v2157_v62 = vmax.f32 %v781_v55, %v785_v51 }
 0x395   : > { %v2159_v63 = vmax.f32 %v782_v58, %v786_v56  ;;  %v2161_v0 = vmax.f32 %v783_v60, %v787_v57  ;;  %v792_v40 = vadd.f32 %v2157_v62, %v2155_v61  ;;  %v808_v43 = vmul.f32 %v2155_v61, %v2155_v61 }
 0x396   : > { %v809_v30 = vmul.f32 %v2157_v62, %v2157_v62 }
 0x397   : > { %v793_v47 = vrot.slane %v792_v40, 4  ;;  %v799_v52 = vadd.f32 %v2161_v0, %v2159_v63  ;;  %v810_v1 = vmul.f32 %v2159_v63, %v2159_v63  ;;  %v811_v2 = vmul.f32 %v2161_v0, %v2161_v0 }
 0x398   : > { %v812_v3 = vadd.f32 %v809_v30, %v808_v43 }
 0x399   : > { %v794_v4 = vadd.f32 %v793_v47, %v792_v40  ;;  %v800_v5 = vrot.slane %v799_v52, 4  ;;  %v819_v6 = vadd.f32 %v811_v2, %v810_v1 }
 0x39a   : > { %v813_v7 = vrot.slane %v812_v3, 4 }
 0x39b   : > { %v795_v8 = vrot.slane %v794_v4, 2  ;;  %v801_v9 = vadd.f32 %v800_v5, %v799_v52  ;;  %v820_v10 = vrot.slane %v819_v6, 4 }
 0x39c   : > { %v814_v11 = vadd.f32 %v813_v7, %v812_v3 }
 0x39d   : > { %v796_v12 = vadd.f32 %v795_v8, %v794_v4  ;;  %v802_v14 = vrot.slane %v801_v9, 2  ;;  %v821_v15 = vadd.f32 %v820_v10, %v819_v6 }
 0x39e   : > { %v815_v16 = vrot.slane %v814_v11, 2 }
 0x39f   : > { %v797_v17 = vrot.slane %v796_v12, 1  ;;  %v803_v59 = vadd.f32 %v802_v14, %v801_v9  ;;  %v822_v13 = vrot.slane %v821_v15, 2 }
 0x3a0   : > { %v816_v18 = vadd.f32 %v815_v16, %v814_v11  ;;  %v894_v16 = vsub.s32 3, %v2095_v26 }
 0x3a1   : > { %v798_v19 = vadd.f32 %v797_v17, %v796_v12  ;;  %v804_v20 = vrot.slane %v803_v59, 1  ;;  %v823_v21 = vadd.f32 %v822_v13, %v821_v15 }
 0x3a2   : > { %v817_v22 = vrot.slane %v816_v18, 1  ;;  %v895_v17 = vrot.slane %v2101_v34, %v894_v16 }
 0x3a3   : > { %v805_v23 = vadd.f32 %v804_v20, %v803_v59  ;;  %v806_v24 = vmul.f32 0.0625, %v798_v19  ;;  %v824_v25 = vrot.slane %v823_v21, 1 }
 0x3a4   : > { %v818_v27 = vadd.f32 %v817_v22, %v816_v18 }
 0x3a5   : > { %v807_v28 = vmul.f32 0.0625, %v805_v23  ;;  %v825_v29 = vadd.f32 %v824_v25, %v823_v21  ;;  %v828_v31 = vmul.f32 %v806_v24, %v806_v24  ;;  %v852_v56 = vsub.f32 %v2155_v61, %v806_v24 }
 0x3a6   : > { %v826_v32 = vmul.f32 0.0625, %v818_v27  ;;  %v853_v57 = vsub.f32 %v2157_v62, %v806_v24 }
 0x3a7   : > { %v827_v33 = vmul.f32 0.0625, %v825_v29  ;;  %v829_v35 = vmul.f32 %v807_v28, %v807_v28  ;;  %v854_v60 = vsub.f32 %v2159_v63, %v807_v28  ;;  %v855_v40 = vsub.f32 %v2161_v0, %v807_v28 }
 0x3a8   : > { %v830_v36 = vsub.f32 %v826_v32, %v828_v31 }
 0x3a9   : > { %v831_v37 = vsub.f32 %v827_v33, %v829_v35 }
 0x3aa   : > { %v832_v38 = vmax.f32 %v830_v36, 0.0 }
 0x3ab   : > { %v833_v39 = vmax.f32 %v831_v37, 0.0 }
 0x3ac   : > { %1549 = vrsqrt.f32 %v832_v38  ;;  %vm836_vm2 = vcmp.eq.f32.partialorder %v832_v38, inf  ;;  %v839_v45 = vand.u32 2147483648, %v832_v38  ;;  %vm838_vm3 = vcmp.eq.f32.partialorder %v832_v38, 0.0 }
 0x3ad   : > { %1551 = vrsqrt.f32 %v833_v39  ;;  %vm843_vm4 = vcmp.eq.f32.partialorder %v833_v39, inf  ;;  %v846_v49 = vand.u32 2147483648, %v833_v39  ;;  %vm845_vm5 = vcmp.eq.f32.partialorder %v833_v39, 0.0 }
 0x3b6   : > { %v1550_v41 = vpop.eup %1549 }
 0x3b7   : > { %v1552_v42 = vpop.eup %1551  ;;  %v835_v44 = vmul.f32 %v1550_v41, %v832_v38 }
 0x3b8   : > { %v842_v46 = vmul.f32 %v1552_v42, %v833_v39 }
 0x3b9   : > { %v837_v48 = vsel %vm836_vm2, %v832_v38, %v835_v44 }
 0x3ba   : > { %v840_v50 = vsel %vm838_vm3, %v839_v45, %v837_v48  ;;  %v844_v51 = vsel %vm843_vm4, %v833_v39, %v842_v46 }
 0x3bb   : > { %v847_v53 = vsel %vm845_vm5, %v846_v49, %v844_v51  ;;  %v848_v54 = vadd.f32 1e-07, %v840_v50 }
 0x3bc   : > { %v849_v55 = vadd.f32 1e-07, %v847_v53 }
 0x3bd   : > { %1553 = vrcp.f32 %v848_v54 }
 0x3be   : > { %1555 = vrcp.f32 %v849_v55 }
 0x3c7   : > { %v1554_v58 = vpop.eup %1553 }
 0x3c8   : > { %v1556_v43 = vpop.eup %1555  ;;  %v856_v30 = vmul.f32 %v1554_v58, %v852_v56  ;;  %v857_v47 = vmul.f32 %v1554_v58, %v853_v57 }
 0x3c9   : > { %v858_v52 = vmul.f32 %v1556_v43, %v854_v60  ;;  %v859_v1 = vmul.f32 %v1556_v43, %v855_v40 }
 0x3ca   : > { %v860_v2 = vadd.f32 %v857_v47, %v856_v30 }
 0x3cb   : > { %v867_v3 = vadd.f32 %v859_v1, %v858_v52 }
 0x3cc   : > { %v861_v4 = vrot.slane %v860_v2, 4 }
 0x3cd   : > { %v868_v5 = vrot.slane %v867_v3, 4 }
 0x3ce   : > { %v862_v6 = vadd.f32 %v861_v4, %v860_v2 }
 0x3cf   : > { %v869_v7 = vadd.f32 %v868_v5, %v867_v3 }
 0x3d0   : > { %v863_v61 = vrot.slane %v862_v6, 2 }
 0x3d1   : > { %v870_v62 = vrot.slane %v869_v7, 2 }
 0x3d2   : > { %v864_v8 = vadd.f32 %v863_v61, %v862_v6 }
 0x3d3   : > { %v871_v9 = vadd.f32 %v870_v62, %v869_v7 }
 0x3d4   : > { %v865_v63 = vrot.slane %v864_v8, 1 }
 0x3d5   : > { %v872_v10 = vrot.slane %v871_v9, 1 }
 0x3d6   : > { %v866_v0 = vadd.f32 %v865_v63, %v864_v8 }
 0x3d7   : > { %v873_v11 = vadd.f32 %v872_v10, %v871_v9 }
 0x3d8   : > { %v874_v12 = vmul.f32 0.0625, %v866_v0 }
 0x3d9   : > { %v875_v14 = vmul.f32 0.0625, %v873_v11 }
 0x3db   : > { %v898_v15 = vsel %vm532_vm1, %v875_v14, %v874_v12 }
 0x3dc   : > { %1320 = vmatmul.mubr.f32.vlgmr.msra.gmra.mrb[2].mxu1 %v898_v15 }
 0x4af   : > { %v966_v59 = vpop.f32.mrb[2].mxu1 }
 0x4b0   : > { %v967_v13 = vadd.f32 %v966_v59, %v895_v17  ;;  %v1321_v18 = vpop.f32.mrb[3].mxu1 }
 0x4b2   : > { %970 = vst [vmem:[%s356_s15] sm:$0x3] %v967_v13 }
 0x4b3   : > { %1712 = shalt.err (!%p1709_p13)
}
 0x4b4   : > { %s1713_s24 = scalar_lea.hbm %s2187_s16, 32  ;;  %s1717_s25 = scalar_lea.hbm %s2238_s7, 64 }
 0x4b5   : > { %p1714_p9 = scmp.ne.s32.totalorder %s2187_s16, %s1713_s24  ;;  %p1718_p4 = scmp.lt.u32.totalorder %s2187_s16, %s2238_s7 }
 0x4b6   : > { %p1719_p8 = scmp.lt.u32.totalorder %s1717_s25, %s1713_s24  ;;  %p1721_p3 = scmp.lt.u32.totalorder %s1713_s24, %s2187_s16 }
 0x4b7   : > { %p1715_p0 = pnand %p1714_p9, %p2003_p10 }
 0x4b8   : > { %p1720_p6 = por %p1719_p8, %p1718_p4 }
 0x4b9   : > { %p1716_p11 = pneg %p1715_p0 }
 0x4ba   : > { %p1722_p5 = por %p1721_p3, %p1720_p6 }
 0x4bc   : > { %p1723_p7 = pnand %p1722_p5, %p1716_p11 }
 0x4be   : > { %1726 = shalt.err (!%p1723_p7)
}
 0x4bf   : > { %1444 = dma.vmem_to_hbm [thread:$0]  (%p2003_p10), %s2189_s19, 32, %s2187_s16, %s972_s18  }
 0x4c0 PF: > { %s997_s15 = sand.u32 1, %s1761_s26   ;;  %p2256_p12 = scmp.ne.s32.totalorder %s2243_s9, 0 }
 0x4c1   : > { %p2257_p1 = scmp.ge.s32.totalorder %s1773_s29, 2  ;;  %s998_s30 = scalar_lea.sflag [#allocation5], %s997_s15 }
 0x4c3   : > { %p1464_p2 = pnand %p2257_p1, %p2256_p12 }
 0x4c5   : > { %1756 = dma.done.wait (!%p1464_p2), %s998_s30, 32  }
 0x4c6   : > { %1758 = vsyncadd (!%p1464_p2), %s998_s30, 4294967264  ;;  %p23_p13 = scmp.ge.s32.totalorder %s1993_s23, 4   ;;  %s2258_s26 = smov %s1765_s27 }
 0x4c7   : > { %s2259_s27 = smov %s1769_s28  ;;  %s2260_s28 = smov %s2009_s21 }
 0x4c8   : > { %s2261_s29 = smov %s1993_s23  ;;  %25 = sbr.rel (!%p23_p13) target bundleno = 9 (0x9), region = 109 }
 0x4cf   :  { %1003 = vsyncpa [#allocation4], 1 }
 0x4d0   :  { %1005 = vsyncpa [#allocation4 + $0x1], 1 }
 0x4d1   :  { %1006 = vsyncpa [#allocation7], 1 }
 0x4d2   :  { %1007 = vsyncpa [#allocation10], 1 }
 0x4d3   :  { %1008 = vsyncpa [#allocation5], 1 }
 0x4d4   :  { %1010 = vsyncpa [#allocation5 + $0x1], 1 }

</bundles_post_ra>
